<compile_context>
chip_gen: v6e
topology: v6e:2x2x1
jax: 0.10.0
libtpu: 0.0.40
codegen_flags: <defaults>
</compile_context>

<pallas_src>
import functools

import jax
import jax.numpy as jnp
from jax import lax
from jax.experimental import pallas as pl
from jax.experimental.pallas import tpu as pltpu


class Vocab:
    """Minimal deterministic vocabulary matching the PyTorch module's API."""

    def __init__(self, words=()):
        self.word2idx = {}
        self.idx2word = []
        for w in ("<pad>", "<start>", "<end>", "<unk>"):
            self.add_word(w)
        for w in words:
            self.add_word(w)

    def add_word(self, w):
        if w not in self.word2idx:
            self.word2idx[w] = len(self.idx2word)
            self.idx2word.append(w)

    def __call__(self, w):
        return self.word2idx.get(w, self.word2idx["<unk>"])

    def __len__(self):
        return len(self.idx2word)


def _i32(c):
    """Wrap a python int into int32 two's-complement range (uint32 -> int32 bits)."""
    c &= 0xFFFFFFFF
    return c - (1 << 32) if c >= (1 << 31) else c


# splitmix32-style constants.
_C1 = 0x9E3779B1
_C2 = 0x85EBCA77
_C3 = 0xC2B2AE3D


def _mlm_kernel(seed_ref, labels_ref, out_ref, *, threshold_32, fast_special,
                pad_id, start_id, end_id, mask_id):
    tb, ts = labels_ref.shape
    labels = labels_ref[...]

    # ---- scalar (sreg) fold of all per-tile offsets -------------------------
    # Global coords are (i*TB + r, j*TS + c). Because int32 multiply wraps
    # mod 2^32 (two's complement == uint32 math bit-for-bit, and * distributes
    # over +), the grid/seed contribution folds into ONE scalar offset:
    #   off = (i*TB)*C1 + (j*TS)*C2 + seed*C3
    # keeping the randomness grid-invariant while removing 2-3 vector adds.
    i = pl.program_id(0)
    j = pl.program_id(1)
    seed = seed_ref[0]
    off = (i * jnp.int32(_i32(_C1 * tb))
           + j * jnp.int32(_i32(_C2 * ts))
           + seed * jnp.int32(_i32(_C3)))

    # ---- vector injection: 2 vmul + 2 vadd ----------------------------------
    x = (lax.broadcasted_iota(jnp.int32, (tb, ts), 0) * jnp.int32(_i32(_C1))
         + lax.broadcasted_iota(jnp.int32, (tb, ts), 1) * jnp.int32(_i32(_C2))
         + off)

    # splitmix32 finalizer (kept at full strength for distribution quality).
    # TODO(synk): a 2-round fmix would save ~3 VALU ops/vreg if quality allows.
    x = x ^ lax.shift_right_logical(x, jnp.int32(16))
    x = x * jnp.int32(_i32(0x7FEB352D))
    x = x ^ lax.shift_right_logical(x, jnp.int32(15))
    x = x * jnp.int32(_i32(0x846CA68B))
    x = x ^ lax.shift_right_logical(x, jnp.int32(16))

    # Full 32-bit unsigned draw: one compare, no `& 0x7FFFFFFF`.
    # P(hit) == threshold_32 / 2^32 ~= mask_prob.
    rand_hit = pltpu.bitcast(x, jnp.uint32) < jnp.uint32(threshold_32)

    if fast_special:
        # pad/start/end are the contiguous lowest IDs {0,1,2} and every regular
        # (non-negative) token id is larger -> single compare.
        not_special = labels > jnp.int32(max(pad_id, start_id, end_id))
    else:
        not_special = ((labels != jnp.int32(pad_id))
                       & (labels != jnp.int32(start_id))
                       & (labels != jnp.int32(end_id)))

    out_ref[...] = jnp.where(rand_hit & not_special, jnp.int32(mask_id), labels)


def _choose_tiles(B, S, elem_bytes=4):
    """Pick (TB, TS): ~1 MiB blocks, >=4 grid steps once the array is non-tiny.

    Constraints: TB % 8 == 0 or TB == B; TS % 128 == 0 or TS == S.
    """
    SMALL_BYTES = 256 << 10    # below this, per-step overhead would dominate
    TARGET_BLOCK = 1 << 20     # ~1 MiB blocks: at the measured HBM-roofline knee
    MIN_STEPS = 4              # pipelining + >=2 blocks per TC on v7x megacore

    total = B * S * elem_bytes
    if total <= SMALL_BYTES:
        return B, S            # tiny input: single full-extent block

    n_blocks = max(MIN_STEPS, pl.cdiv(total, TARGET_BLOCK))

    # Split along B first (keeps the lane axis S dense).
    grid_b = min(n_blocks, max(1, B // 8))
    TB = pl.cdiv(B, grid_b)
    TB = ((TB + 7) // 8) * 8
    if TB >= B:
        TB = B
    grid_b = pl.cdiv(B, TB)

    # Remaining split along S.
    grid_s = pl.cdiv(n_blocks, grid_b)
    if grid_s <= 1:
        TS = S
    else:
        TS = ((pl.cdiv(S, grid_s) + 127) // 128) * 128
        if TS >= S:
            TS = S
    return TB, TS


def mlm_mask_ids(labels, seed, *, mask_prob, pad_id, start_id, end_id, mask_id,
                 tb=None, ts=None):
    """Tiled Pallas wrapper. No padding / slicing: Pallas handles edge tiles."""
    labels = jnp.asarray(labels)
    if labels.dtype != jnp.int32:
        # TODO(synk): require int32 (or int16) labels upstream; this conversion
        # is an extra full HBM pass on a purely bandwidth-bound kernel.
        labels = labels.astype(jnp.int32)
    B, S = labels.shape

    if tb is None and ts is None:
        TB, TS = _choose_tiles(B, S)
    else:
        tb = 512 if tb is None else tb
        ts = 1024 if ts is None else ts
        TB = B if tb >= B else tb
        TS = S if ts >= S else ts
        if TB < B:
            assert TB % 8 == 0
        if TS < S:
            assert TS % 128 == 0
    grid = (pl.cdiv(B, TB), pl.cdiv(S, TS))

    # Full 32-bit threshold; clamped so mask_prob in [0, 1] never overflows.
    threshold_32 = max(0, min(int(round(mask_prob * (1 << 32))), (1 << 32) - 1))

    # Single-compare special-token test is only valid when pad/start/end are
    # the contiguous lowest IDs and all regular token ids are larger.
    fast_special = sorted({int(pad_id), int(start_id), int(end_id)}) == [0, 1, 2]

    kernel = functools.partial(
        _mlm_kernel, threshold_32=threshold_32, fast_special=fast_special,
        pad_id=int(pad_id), start_id=int(start_id),
        end_id=int(end_id), mask_id=int(mask_id))

    return pl.pallas_call(
        kernel,
        out_shape=jax.ShapeDtypeStruct((B, S), jnp.int32),
        grid=grid,
        in_specs=[
            pl.BlockSpec(memory_space=pltpu.MemorySpace.SMEM),   # seed scalar
            pl.BlockSpec((TB, TS), lambda i, j: (i, j)),         # labels tile
        ],
        out_specs=pl.BlockSpec((TB, TS), lambda i, j: (i, j)),
        compiler_params=pltpu.CompilerParams(
            dimension_semantics=("parallel", "parallel"),
            vmem_limit_bytes=32 * 1024 * 1024,
        ),
    )(jnp.asarray([seed], dtype=jnp.int32), labels)


class MLM:
    """Mask Language Model (JAX/Pallas port of the PyTorch module)."""

    def __init__(self, vocab, mask_prob=0.15):
        vocab.add_word("<mask>")
        self.vocab = vocab
        self.mask_prob = mask_prob

    def mask_ids(self, labels, seed=0):
        return mlm_mask_ids(
            labels, seed,
            mask_prob=self.mask_prob,
            pad_id=self.vocab("<pad>"),
            start_id=self.vocab("<start>"),
            end_id=self.vocab("<end>"),
            mask_id=self.vocab("<mask>"),
        )

    def __call__(self, labels, seed=0):
        return self.mask_ids(labels, seed)


if __name__ == "__main__":
    # Deterministic tiny vocab: 4 special tokens + 20 words, then '<mask>' added.
    vocab = Vocab(words=[f"w{i}" for i in range(20)])
    mlm = MLM(vocab, mask_prob=0.15)

    pad_id = vocab("<pad>")
    start_id = vocab("<start>")
    end_id = vocab("<end>")
    mask_id = vocab("<mask>")
    kw = dict(mask_prob=0.15, pad_id=pad_id, start_id=start_id,
              end_id=end_id, mask_id=mask_id)

    # --- Test 1: small labels batch (B, S) = (2, 16) ---------------------------
    key = jax.random.PRNGKey(0)
    B, S = 2, 16
    body = jax.random.randint(key, (B, S - 2), 4, len(vocab) - 1, dtype=jnp.int32)
    labels = jnp.concatenate(
        [jnp.full((B, 1), start_id, jnp.int32),
         body,
         jnp.full((B, 1), end_id, jnp.int32)], axis=1)
    labels = labels.at[0, -4:].set(pad_id)

    out = jax.block_until_ready(mlm(labels, seed=0))
    out_np = jax.device_get(out)
    lab_np = jax.device_get(labels)

    # Semantics checks: special tokens never masked; every change is -> <mask>.
    special = (lab_np == pad_id) | (lab_np == start_id) | (lab_np == end_id)
    assert (out_np[special] == lab_np[special]).all()
    changed = out_np != lab_np
    assert (out_np[changed] == mask_id).all()
    assert out_np.shape == lab_np.shape and out_np.dtype == lab_np.dtype

    # --- Test 2: multi-tile grid with edge tiles; grid-invariant randomness ----
    B2, S2 = 24, 300
    labels2 = jax.random.randint(jax.random.PRNGKey(1), (B2, S2), 4,
                                 len(vocab) - 1, dtype=jnp.int32)
    out_tiled = mlm_mask_ids(labels2, 7, tb=8, ts=128, **kw)     # 3x3 grid, edge tiles
    out_full = mlm_mask_ids(labels2, 7, tb=512, ts=1024, **kw)   # single full block
    out_tiled, out_full = jax.block_until_ready((out_tiled, out_full))

    assert bool(jnp.all(out_tiled == out_full))                  # tiling-independent
    ch2 = jax.device_get(out_full != labels2)
    assert (jax.device_get(out_full)[ch2] == mask_id).all()
    frac = float(ch2.mean())
    assert 0.08 < frac < 0.25, frac                              # ~mask_prob masked

    # --- Test 3: heuristic (pipelined, multi-step) grid vs single block --------
    B3, S3 = 64, 2048
    labels3 = jax.random.randint(jax.random.PRNGKey(2), (B3, S3), 4,
                                 len(vocab) - 1, dtype=jnp.int32)
    out_auto = mlm_mask_ids(labels3, 11, **kw)                   # heuristic tiles
    out_one = mlm_mask_ids(labels3, 11, tb=B3, ts=S3, **kw)      # single block
    out_auto, out_one = jax.block_until_ready((out_auto, out_one))

    assert bool(jnp.all(out_auto == out_one))                    # tiling-independent
    ch3 = jax.device_get(out_auto != labels3)
    assert (jax.device_get(out_auto)[ch3] == mask_id).all()
    frac3 = float(ch3.mean())
    assert 0.10 < frac3 < 0.20, frac3

    print("KERNEL_OK")
</pallas_src>

<mosaic_0001>
module attributes {stable_mosaic.version = 11 : i64} {
  func.func @_mlm_kernel(%arg0: i32, %arg1: i32, %arg2: memref<1xi32, #tpu.memory_space<smem>>, %arg3: memref<2x16xi32, #tpu.memory_space<vmem>>, %arg4: memref<2x16xi32, #tpu.memory_space<vmem>>) attributes {dimension_semantics = [#tpu.dimension_semantics<parallel>, #tpu.dimension_semantics<parallel>], iteration_bounds = array<i64: 1, 1>, scalar_prefetch = 0 : i64, scratch_operands = 0 : i64, tpu.core_type = #tpu.core_type<tc>, window_params = [{transform_indices = @transform_0, window_bounds = array<i64: 1>}, {transform_indices = @transform_1, window_bounds = array<i64: 2, 16>}, {transform_indices = @transform_2, window_bounds = array<i64: 2, 16>}]} {
    %c0 = arith.constant 0 : index
    %c0_0 = arith.constant 0 : index
    %0 = vector.load %arg3[%c0, %c0_0] : memref<2x16xi32, #tpu.memory_space<vmem>>, vector<2x16xi32>
    %c0_1 = arith.constant 0 : index
    %1 = memref.load %arg2[%c0_1] : memref<1xi32, #tpu.memory_space<smem>>
    %c1013904226_i32 = arith.constant 1013904226 : i32
    %2 = arith.muli %arg0, %c1013904226_i32 : i32
    %c1589421936_i32 = arith.constant 1589421936 : i32
    %3 = arith.muli %arg1, %c1589421936_i32 : i32
    %4 = arith.addi %2, %3 : i32
    %c-1028477379_i32 = arith.constant -1028477379 : i32
    %5 = arith.muli %1, %c-1028477379_i32 : i32
    %6 = arith.addi %4, %5 : i32
    %7 = tpu.iota {dimensions = array<i32: 0>} : vector<2x16xi32>
    %c-1640531535_i32 = arith.constant -1640531535 : i32
    %8 = vector.broadcast %c-1640531535_i32 : i32 to vector<2x16xi32>
    %9 = arith.muli %7, %8 : vector<2x16xi32>
    %10 = tpu.iota {dimensions = array<i32: 1>} : vector<2x16xi32>
    %c-2048144777_i32 = arith.constant -2048144777 : i32
    %11 = vector.broadcast %c-2048144777_i32 : i32 to vector<2x16xi32>
    %12 = arith.muli %10, %11 : vector<2x16xi32>
    %13 = arith.addi %9, %12 : vector<2x16xi32>
    %14 = vector.broadcast %6 : i32 to vector<2x16xi32>
    %15 = arith.addi %13, %14 : vector<2x16xi32>
    %c16_i32 = arith.constant 16 : i32
    %16 = vector.broadcast %c16_i32 : i32 to vector<2x16xi32>
    %17 = arith.shrui %15, %16 : vector<2x16xi32>
    %18 = arith.xori %15, %17 : vector<2x16xi32>
    %c2146121005_i32 = arith.constant 2146121005 : i32
    %19 = vector.broadcast %c2146121005_i32 : i32 to vector<2x16xi32>
    %20 = arith.muli %18, %19 : vector<2x16xi32>
    %c15_i32 = arith.constant 15 : i32
    %21 = vector.broadcast %c15_i32 : i32 to vector<2x16xi32>
    %22 = arith.shrui %20, %21 : vector<2x16xi32>
    %23 = arith.xori %20, %22 : vector<2x16xi32>
    %c-2073254261_i32 = arith.constant -2073254261 : i32
    %24 = vector.broadcast %c-2073254261_i32 : i32 to vector<2x16xi32>
    %25 = arith.muli %23, %24 : vector<2x16xi32>
    %c16_i32_2 = arith.constant 16 : i32
    %26 = vector.broadcast %c16_i32_2 : i32 to vector<2x16xi32>
    %27 = arith.shrui %25, %26 : vector<2x16xi32>
    %28 = arith.xori %25, %27 : vector<2x16xi32>
    %29 = tpu.bitcast %28 : vector<2x16xi32> -> vector<2x16xi32>
    %c644245094_i32 = arith.constant 644245094 : i32
    %30 = vector.broadcast %c644245094_i32 : i32 to vector<2x16xi32>
    %31 = arith.cmpi ult, %29, %30 : vector<2x16xi32>
    %c2_i32 = arith.constant 2 : i32
    %32 = vector.broadcast %c2_i32 : i32 to vector<2x16xi32>
    %33 = arith.cmpi sgt, %0, %32 : vector<2x16xi32>
    %34 = arith.andi %31, %33 : vector<2x16xi1>
    %c24_i32 = arith.constant 24 : i32
    %35 = vector.broadcast %c24_i32 : i32 to vector<2x16xi32>
    %36 = arith.select %34, %35, %0 : vector<2x16xi1>, vector<2x16xi32>
    %c0_3 = arith.constant 0 : index
    %c0_4 = arith.constant 0 : index
    %37 = vector.load %arg4[%c0_3, %c0_4] : memref<2x16xi32, #tpu.memory_space<vmem>>, vector<2x16xi32>
    tpu.vector_store %arg4[%c0_3, %c0_4], %36 {strides = array<i32>} : memref<2x16xi32, #tpu.memory_space<vmem>>, vector<2x16xi32>,
    return
  }
  func.func @transform_0(%arg0: i32, %arg1: i32) -> i32 {
    %c0_i32 = arith.constant 0 : i32
    %c0_i32_0 = arith.constant 0 : i32
    return %c0_i32 : i32
  }
  func.func @transform_1(%arg0: i32, %arg1: i32) -> (i32, i32) {
    %c0_i32 = arith.constant 0 : i32
    return %arg0, %arg1 : i32, i32
  }
  func.func @transform_2(%arg0: i32, %arg1: i32) -> (i32, i32) {
    %c0_i32 = arith.constant 0 : i32
    return %arg0, %arg1 : i32, i32
  }
}

</mosaic_0001>

<bundles_post_ra>
// kernel: tpu_custom_call.1
= control target key start
LH: loop header
LB: loop body
LE: loop exit
PB: predicated region body
PF: predicated region fallthrough
CT: control target
= control target key end

     0   :  { %v20_v0 = vlaneseq  ;;  %s105_s0 = inlined_call_operand.<no memory space> [shape: s32[1], index: 0, kind: input, shape index: {}]   ;;  %s106_s1 = inlined_call_operand.vmem [shape: s32[2,16], index: 1, kind: input, shape index: {}]   ;;  %s107_s2 = inlined_call_operand.hbm [shape: s32[2,16], index: 2, kind: output, shape index: {}]  }
   0x1   :  { %s18_s11 = smul.u32 3266489917, %s105_s0 }
   0x2   :  { %8 = vsyncpa [#allocation4], 0  ;;  %v21_v1 = vshrl.u32 %v20_v0, 7  ;;  %v24_v2 = vand.u32 127, %v20_v0  ;;  %v13_v14 = vld [vmem:[%s106_s1] sm:$0x3] }
   0x3   :  { %v27_v5 = vstv %s18_s11  ;;  %vm38_vm0 = vcmp.gt.s32.totalorder %v13_v14, 2  ;;  %s80_s0 = smov [#allocation3]   ;;  %vm41_vm2 = vcmask 123904  }
   0x4   :  { %v22_v3 = vmul.u32 2654435761, %v21_v1  ;;  %v25_v4 = vmul.u32 2246822519, %v24_v2  ;;  %s49_s14 = sshll.u32 %s80_s0, 4  ;;  %s50_s14 = int_to_ptr.vmem [resolvable:$true] %s49_s14 }
   0x5   :  { %s58_s15 = scalar_lea.vmem %s50_s14, 32  ;;  %p63_p1 = scmp.lt.s32.totalorder %s50_s14, %s50_s14 }
   0x6   :  { %v26_v6 = vadd.s32 %v25_v4, %v22_v3  ;;  %p59_p0 = scmp.ne.s32.totalorder %s50_s14, %s58_s15  ;;  %p64_p2 = scmp.lt.s32.totalorder %s58_s15, %s58_s15 }
   0x8   :  { %v28_v7 = vadd.s32 %v27_v5, %v26_v6  ;;  %p65_p3 = por %p64_p2, %p63_p1 }
   0xa   :  { %v29_v8 = vshrl.u32 %v28_v7, 16  ;;  %p66_p4 = pnand %p65_p3, %p59_p0 }
   0xc   :  { %v30_v9 = vxor.u32 %v29_v8, %v28_v7 }
   0xe   :  { %v31_v10 = vmul.u32 2146121005, %v30_v9 }
  0x10   :  { %v32_v11 = vshrl.u32 %v31_v10, 15 }
  0x12   :  { %v33_v12 = vxor.u32 %v32_v11, %v31_v10 }
  0x14   :  { %v34_v13 = vmul.u32 2221713035, %v33_v12 }
  0x16   :  { %v35_v15 = vshrl.u32 %v34_v13, 16 }
  0x18   :  { %v36_v16 = vxor.u32 %v35_v15, %v34_v13 }
  0x1a   :  { %vm37_vm1 = vcmp.lt.u32.totalorder %v36_v16, 644245094 }
  0x1b   :  { %vm39_vm3 = vmand %vm37_vm1, %vm38_vm0 }
  0x1c   :  { %v40_v17 = vsel %vm39_vm3, 24, %v13_v14 }
  0x1d   :  { %42 = vst.msk [vmem:[#allocation3] sm:$0x3] %vm41_vm2, %v40_v17 }
  0x1e   :  { %69 = shalt.err (!%p66_p4)
}
  0x1f   :  { %52 = dma.vmem_to_hbm [thread:$0]  %s50_s14, 32, %s107_s2, [#allocation4]  }
  0x20   :  { %78 = dma.done.wait [#allocation4], 32  }
  0x21   :  { %79 = vsyncadd [#allocation4], 4294967264 }
  0x22   :  { %56 = vsyncpa [#allocation4], 1 }

</bundles_post_ra>
